<compile_context>
chip_gen: v5e
topology: v5e:2x2
jax: 0.10.0
libtpu: 0.0.40
codegen_flags: <defaults>
</compile_context>

<pallas_src>
import functools

import jax
import jax.numpy as jnp
from jax.experimental import pallas as pl
from jax.experimental.pallas import tpu as pltpu


def _round_up(x, m):
    return ((x + m - 1) // m) * m


# ----------------------------------------------------------------------------
# Fused multi-layer LSTM-over-time kernel (one pallas_call per stack)
# ----------------------------------------------------------------------------
def _make_lstm_seq_kernel(n_layers, hidden, collect_hidden):
    """Builds a kernel over grid=(time,).

    Ref layout (positional):
      inputs : x_seq(1,B,E) lens(B,1) w_cat_0..w_cat_{L-1} b_0..b_{L-1} h0(L,B,H) c0(L,B,H)
      outputs: h_fin(L,B,H) c_fin(L,B,H) [hid_seq(1,B,H)]
      scratch: h_sc(L,B,H) c_sc(L,B,H)
    """
    H = hidden

    def kernel(*refs):
        x_seq_ref = refs[0]
        lens_ref = refs[1]
        w_refs = refs[2:2 + n_layers]
        b_refs = refs[2 + n_layers:2 + 2 * n_layers]
        h0_ref = refs[2 + 2 * n_layers]
        c0_ref = refs[3 + 2 * n_layers]
        out0 = 4 + 2 * n_layers
        h_fin_ref = refs[out0]
        c_fin_ref = refs[out0 + 1]
        hid_seq_ref = refs[out0 + 2] if collect_hidden else None
        scr0 = out0 + 2 + (1 if collect_hidden else 0)
        h_sc = refs[scr0]
        c_sc = refs[scr0 + 1]

        t = pl.program_id(0)

        # Load initial state once; scratch persists across grid iterations.
        @pl.when(t == 0)
        def _init():
            h_sc[...] = h0_ref[...]
            c_sc[...] = c0_ref[...]

        # pack_padded_sequence semantics: active while t < src_len[b].
        mask = t < lens_ref[...]          # (B, 1) bool

        x = x_seq_ref[0]                  # (B, E) this timestep's input

        for l in range(n_layers):
            h = h_sc[l]                   # (B, H)
            c = c_sc[l]                   # (B, H)
            d = x.shape[-1]
            w = w_refs[l]                 # (d + H, 4H), resident in VMEM
            gates = (
                jnp.dot(x, w[0:d, :], preferred_element_type=jnp.float32)
                + jnp.dot(h, w[d:d + H, :], preferred_element_type=jnp.float32)
                + b_refs[l][...]
            )                             # (B, 4H), PyTorch gate order [i, f, g, o]
            i_g = jax.nn.sigmoid(gates[:, 0 * H:1 * H])
            f_g = jax.nn.sigmoid(gates[:, 1 * H:2 * H])
            g_g = jnp.tanh(gates[:, 2 * H:3 * H])
            o_g = jax.nn.sigmoid(gates[:, 3 * H:4 * H])

            c_new = f_g * c + i_g * g_g
            h_new = o_g * jnp.tanh(c_new)

            # Freeze state for padded positions (exact for the {0,1} mask).
            h_new = jnp.where(mask, h_new, h)
            c_new = jnp.where(mask, c_new, c)

            h_sc[l] = h_new
            c_sc[l] = c_new
            x = h_new                     # feed next layer

        if collect_hidden:
            hid_seq_ref[0] = x            # top-layer hidden for this timestep

        @pl.when(t == pl.num_programs(0) - 1)
        def _finalize():
            h_fin_ref[...] = h_sc[...]
            c_fin_ref[...] = c_sc[...]

    return kernel


def run_lstm_seq(x_seq, lens, layers, h0, c0, *, hidden, collect_hidden):
    """x_seq:(S,B,E) lens:(B,1)i32 layers:[{w_cat:(in+H,4H), b:(1,4H)}] h0,c0:(L,B,H)."""
    S, B, _E = x_seq.shape
    n_layers = len(layers)
    H = hidden

    const2 = lambda t: (0, 0)
    const3 = lambda t: (0, 0, 0)

    in_specs = [
        pl.BlockSpec((1,) + x_seq.shape[1:], lambda t: (t, 0, 0)),  # time-sliced input
        pl.BlockSpec(lens.shape, const2),                           # lens, loaded once
    ]
    args = [x_seq, lens]
    for lp in layers:                                               # resident weights
        in_specs.append(pl.BlockSpec(lp["w_cat"].shape, const2))
        args.append(lp["w_cat"])
    for lp in layers:                                               # resident biases
        in_specs.append(pl.BlockSpec(lp["b"].shape, const2))
        args.append(lp["b"])
    in_specs += [pl.BlockSpec((n_layers, B, H), const3),
                 pl.BlockSpec((n_layers, B, H), const3)]
    args += [h0, c0]

    out_shape = [jax.ShapeDtypeStruct((n_layers, B, H), jnp.float32),
                 jax.ShapeDtypeStruct((n_layers, B, H), jnp.float32)]
    out_specs = [pl.BlockSpec((n_layers, B, H), const3),
                 pl.BlockSpec((n_layers, B, H), const3)]
    if collect_hidden:
        out_shape.append(jax.ShapeDtypeStruct((S, B, H), jnp.float32))
        out_specs.append(pl.BlockSpec((1, B, H), lambda t: (t, 0, 0)))

    kernel = _make_lstm_seq_kernel(n_layers=n_layers, hidden=H,
                                   collect_hidden=collect_hidden)

    return pl.pallas_call(
        kernel,
        out_shape=tuple(out_shape),
        grid_spec=pltpu.PrefetchScalarGridSpec(
            num_scalar_prefetch=0,
            grid=(S,),
            in_specs=in_specs,
            out_specs=tuple(out_specs),
            scratch_shapes=[pltpu.VMEM((n_layers, B, H), jnp.float32),
                            pltpu.VMEM((n_layers, B, H), jnp.float32)],
        ),
        compiler_params=pltpu.CompilerParams(
            dimension_semantics=("arbitrary",)),   # time axis is recurrent
    )(*args)


# ----------------------------------------------------------------------------
# Output projection: one lane-dense matmul over the whole decoded slab
# ----------------------------------------------------------------------------
def _linear_kernel(x_ref, w_ref, b_ref, o_ref):
    o_ref[...] = (
        jnp.dot(x_ref[...], w_ref[...], preferred_element_type=jnp.float32)
        + b_ref[...]
    )


def linear(x, w_t, b):
    M = x.shape[0]
    Vp = w_t.shape[1]
    vmem = pl.BlockSpec(memory_space=pltpu.MemorySpace.VMEM)
    return pl.pallas_call(
        _linear_kernel,
        out_shape=jax.ShapeDtypeStruct((M, Vp), jnp.float32),
        in_specs=[vmem, vmem, vmem],
        out_specs=vmem,
    )(x, w_t, b)


# ----------------------------------------------------------------------------
# Parameters
# ----------------------------------------------------------------------------
def init_params(key, *, src_vocab, tgt_vocab, emb, hidden, enc_layers, dec_layers):
    """Deterministic init mimicking PyTorch uniform(-1/sqrt(H), 1/sqrt(H))."""
    bound = float(hidden) ** -0.5

    def uni(k, shape):
        return jax.random.uniform(k, shape, jnp.float32, -bound, bound)

    keys = iter(jax.random.split(key, 64))
    params = {}

    params["enc_emb"] = jax.random.normal(next(keys), (src_vocab, emb), jnp.float32) * 0.1
    params["dec_emb"] = jax.random.normal(next(keys), (tgt_vocab, emb), jnp.float32) * 0.1

    def lstm_stack(n_layers, input_dim):
        layers = []
        for l in range(n_layers):
            in_dim = input_dim if l == 0 else hidden
            layers.append({
                # single concatenated, pre-transposed weight: rows [0:in_dim] = W_ih^T,
                # rows [in_dim:] = W_hh^T, gate order [i, f, g, o]
                "w_cat": uni(next(keys), (in_dim + hidden, 4 * hidden)),
                # b_ih + b_hh folded into one (1, 4H) bias
                "b": uni(next(keys), (1, 4 * hidden)) + uni(next(keys), (1, 4 * hidden)),
            })
        return layers

    params["enc_lstm"] = lstm_stack(enc_layers, emb)
    params["dec_lstm"] = lstm_stack(dec_layers, emb)

    # fc weight/bias padded to a lane-dense multiple of 128 on the vocab axis
    v_pad = _round_up(tgt_vocab, 128)
    fc_w = uni(next(keys), (hidden, tgt_vocab))
    fc_b = uni(next(keys), (1, tgt_vocab))
    params["fc_w_t"] = jnp.pad(fc_w, ((0, 0), (0, v_pad - tgt_vocab)))
    params["fc_b"] = jnp.pad(fc_b, ((0, 0), (0, v_pad - tgt_vocab)))
    return params


# ----------------------------------------------------------------------------
# Model glue (embedding lookups, bridge, batch padding) in plain JAX
# ----------------------------------------------------------------------------
def _bridge(state, dec_layers):
    """Seq2Seq._bridge on (L, B, H) stacked states."""
    n = state.shape[0]
    if n == dec_layers:
        return state
    if n < dec_layers:
        pad = jnp.broadcast_to(state[-1:], (dec_layers - n,) + state.shape[1:])
        return jnp.concatenate([state, pad], axis=0)
    return state[:dec_layers]


@functools.partial(jax.jit, static_argnames=("hidden", "dec_layers", "tgt_vocab"))
def seq2seq_forward(params, src, src_lens, tgt, *, hidden, dec_layers, tgt_vocab):
    """Teacher-forced forward; returns (B, T-1, tgt_vocab)."""
    B, S = src.shape
    _, T = tgt.shape
    H = hidden
    B_pad = _round_up(B, 8)                      # fill the 8 sublanes of each vreg

    src_p = jnp.pad(src, ((0, B_pad - B), (0, 0)))
    tgt_p = jnp.pad(tgt, ((0, B_pad - B), (0, 0)))
    lens_p = jnp.pad(src_lens.astype(jnp.int32), (0, B_pad - B))[:, None]   # (B_pad,1)

    # ---- encoder: one fused pallas_call over the S timesteps -----------------
    enc_layers = params["enc_lstm"]
    n_enc = len(enc_layers)
    enc_x = jnp.transpose(params["enc_emb"][src_p], (1, 0, 2))   # (S, B_pad, E)
    h0 = jnp.zeros((n_enc, B_pad, H), jnp.float32)
    c0 = jnp.zeros((n_enc, B_pad, H), jnp.float32)
    h_enc, c_enc = run_lstm_seq(enc_x, lens_p, enc_layers, h0, c0,
                                hidden=H, collect_hidden=False)

    # ---- bridge --------------------------------------------------------------
    h_dec0 = _bridge(h_enc, dec_layers)
    c_dec0 = _bridge(c_enc, dec_layers)

    # ---- decoder: one fused pallas_call over the T-1 teacher-forced steps ----
    dec_x = jnp.transpose(params["dec_emb"][tgt_p[:, :T - 1]], (1, 0, 2))  # (T-1,B_pad,E)
    dec_lens = jnp.full((B_pad, 1), T, dtype=jnp.int32)          # mask always active
    _, _, hid_seq = run_lstm_seq(dec_x, dec_lens, params["dec_lstm"],
                                 h_dec0, c_dec0, hidden=H, collect_hidden=True)

    # ---- fc projection hoisted out of the recurrence: ONE lane-dense matmul --
    v_pad = params["fc_w_t"].shape[1]
    x_slab = hid_seq.reshape((T - 1) * B_pad, H)                 # ((T-1)*B_pad, H)
    logits = linear(x_slab, params["fc_w_t"], params["fc_b"])    # (M, v_pad)
    logits = logits.reshape(T - 1, B_pad, v_pad)[:, :B, :tgt_vocab]
    return jnp.transpose(logits, (1, 0, 2))                      # (B, T-1, V)


# ----------------------------------------------------------------------------
if __name__ == "__main__":
    B = 2
    SRC_LEN = 8
    TGT_LEN = 8
    EMB = 16
    HIDDEN = 32          # 4H = 128 -> lane-aligned gate block
    SRC_VOCAB = 20
    TGT_VOCAB = 24
    ENC_LAYERS = 1
    DEC_LAYERS = 2       # exercises the _bridge padding path
    PAD_IDX = 0

    key = jax.random.PRNGKey(0)
    k_params, k_src, k_tgt = jax.random.split(key, 3)

    params = init_params(
        k_params, src_vocab=SRC_VOCAB, tgt_vocab=TGT_VOCAB, emb=EMB,
        hidden=HIDDEN, enc_layers=ENC_LAYERS, dec_layers=DEC_LAYERS)

    src = jax.random.randint(k_src, (B, SRC_LEN), 1, SRC_VOCAB, dtype=jnp.int32)
    src_lens = jnp.array([SRC_LEN, 5], dtype=jnp.int32)
    # zero out padded positions past src_lens (as a real dataloader would)
    pos = jnp.arange(SRC_LEN)[None, :]
    src = jnp.where(pos < src_lens[:, None], src, PAD_IDX)
    tgt = jax.random.randint(k_tgt, (B, TGT_LEN), 1, TGT_VOCAB, dtype=jnp.int32)

    out = seq2seq_forward(params, src, src_lens, tgt,
                          hidden=HIDDEN, dec_layers=DEC_LAYERS, tgt_vocab=TGT_VOCAB)
    out = jax.block_until_ready(out)

    assert out.shape == (B, TGT_LEN - 1, TGT_VOCAB), out.shape
    assert out.dtype == jnp.float32
    assert bool(jnp.all(jnp.isfinite(out)))
    # TODO(synk): infer_greedy (autoregressive argmax decode) not implemented here.
    print("KERNEL_OK")
</pallas_src>

<mosaic_0001>
module attributes {stable_mosaic.version = 11 : i64} {
  func.func @kernel(%arg0: i32, %arg1: memref<1x8x16xf32, #tpu.memory_space<vmem>>, %arg2: memref<8x1xi32, #tpu.memory_space<vmem>>, %arg3: memref<48x128xf32, #tpu.memory_space<vmem>>, %arg4: memref<1x128xf32, #tpu.memory_space<vmem>>, %arg5: memref<1x8x32xf32, #tpu.memory_space<vmem>>, %arg6: memref<1x8x32xf32, #tpu.memory_space<vmem>>, %arg7: memref<1x8x32xf32, #tpu.memory_space<vmem>>, %arg8: memref<1x8x32xf32, #tpu.memory_space<vmem>>, %arg9: memref<1x8x32xf32, #tpu.memory_space<vmem>>, %arg10: memref<1x8x32xf32, #tpu.memory_space<vmem>>) attributes {dimension_semantics = [#tpu.dimension_semantics<arbitrary>], iteration_bounds = array<i64: 8>, scalar_prefetch = 0 : i64, scratch_operands = 2 : i64, tpu.core_type = #tpu.core_type<tc>, window_params = [{transform_indices = @transform_0, window_bounds = array<i64: 1, 8, 16>}, {pipeline_mode = #tpu.pipeline_mode<synchronous>, transform_indices = @transform_1, window_bounds = array<i64: 8, 1>}, {pipeline_mode = #tpu.pipeline_mode<synchronous>, transform_indices = @transform_2, window_bounds = array<i64: 48, 128>}, {pipeline_mode = #tpu.pipeline_mode<synchronous>, transform_indices = @transform_3, window_bounds = array<i64: 1, 128>}, {pipeline_mode = #tpu.pipeline_mode<synchronous>, transform_indices = @transform_4, window_bounds = array<i64: 1, 8, 32>}, {pipeline_mode = #tpu.pipeline_mode<synchronous>, transform_indices = @transform_5, window_bounds = array<i64: 1, 8, 32>}, {pipeline_mode = #tpu.pipeline_mode<synchronous>, transform_indices = @transform_6, window_bounds = array<i64: 1, 8, 32>}, {pipeline_mode = #tpu.pipeline_mode<synchronous>, transform_indices = @transform_7, window_bounds = array<i64: 1, 8, 32>}]} {
    %c0_i32 = arith.constant 0 : i32
    %0 = arith.cmpi eq, %arg0, %c0_i32 : i32
    %1 = arith.extui %0 : i1 to i32
    %c0_i32_0 = arith.constant 0 : i32
    %2 = arith.cmpi ne, %1, %c0_i32_0 : i32
    scf.if %2 {
      %c0_27 = arith.constant 0 : index
      %c0_28 = arith.constant 0 : index
      %c0_29 = arith.constant 0 : index
      %60 = vector.load %arg5[%c0_27, %c0_28, %c0_29] : memref<1x8x32xf32, #tpu.memory_space<vmem>>, vector<1x8x32xf32>
      %c0_30 = arith.constant 0 : index
      %c0_31 = arith.constant 0 : index
      %c0_32 = arith.constant 0 : index
      %61 = vector.load %arg9[%c0_30, %c0_31, %c0_32] : memref<1x8x32xf32, #tpu.memory_space<vmem>>, vector<1x8x32xf32>
      tpu.vector_store %arg9[%c0_30, %c0_31, %c0_32], %60 {strides = array<i32>} : memref<1x8x32xf32, #tpu.memory_space<vmem>>, vector<1x8x32xf32>,
      %c0_33 = arith.constant 0 : index
      %c0_34 = arith.constant 0 : index
      %c0_35 = arith.constant 0 : index
      %62 = vector.load %arg6[%c0_33, %c0_34, %c0_35] : memref<1x8x32xf32, #tpu.memory_space<vmem>>, vector<1x8x32xf32>
      %c0_36 = arith.constant 0 : index
      %c0_37 = arith.constant 0 : index
      %c0_38 = arith.constant 0 : index
      %63 = vector.load %arg10[%c0_36, %c0_37, %c0_38] : memref<1x8x32xf32, #tpu.memory_space<vmem>>, vector<1x8x32xf32>
      tpu.vector_store %arg10[%c0_36, %c0_37, %c0_38], %62 {strides = array<i32>} : memref<1x8x32xf32, #tpu.memory_space<vmem>>, vector<1x8x32xf32>,
    } else {
    }
    %c0 = arith.constant 0 : index
    %c0_1 = arith.constant 0 : index
    %3 = vector.load %arg2[%c0, %c0_1] : memref<8x1xi32, #tpu.memory_space<vmem>>, vector<8x1xi32>
    %4 = vector.broadcast %arg0 : i32 to vector<8x1xi32>
    %5 = arith.cmpi slt, %4, %3 : vector<8x1xi32>
    %c0_2 = arith.constant 0 : index
    %c0_3 = arith.constant 0 : index
    %c0_4 = arith.constant 0 : index
    %6 = vector.load %arg1[%c0_2, %c0_3, %c0_4] : memref<1x8x16xf32, #tpu.memory_space<vmem>>, vector<1x8x16xf32>
    %7 = vector.shape_cast %6 : vector<1x8x16xf32> to vector<8x16xf32>
    %c0_5 = arith.constant 0 : index
    %c0_6 = arith.constant 0 : index
    %c0_7 = arith.constant 0 : index
    %8 = vector.load %arg9[%c0_5, %c0_6, %c0_7] : memref<1x8x32xf32, #tpu.memory_space<vmem>>, vector<1x8x32xf32>
    %9 = vector.shape_cast %8 : vector<1x8x32xf32> to vector<8x32xf32>
    %c0_8 = arith.constant 0 : index
    %c0_9 = arith.constant 0 : index
    %c0_10 = arith.constant 0 : index
    %10 = vector.load %arg10[%c0_8, %c0_9, %c0_10] : memref<1x8x32xf32, #tpu.memory_space<vmem>>, vector<1x8x32xf32>
    %11 = vector.shape_cast %10 : vector<1x8x32xf32> to vector<8x32xf32>
    %c0_11 = arith.constant 0 : index
    %c0_12 = arith.constant 0 : index
    %12 = vector.load %arg3[%c0_11, %c0_12] : memref<48x128xf32, #tpu.memory_space<vmem>>, vector<16x128xf32>
    %cst = arith.constant dense<0.000000e+00> : vector<8x128xf32>
    %13 = tpu.matmul %7, %12, %cst {dimension_numbers = #tpu.dot_dimension_numbers<[1], [0], [0], [1], [0, 0, 1, 1], [], []>} : vector<8x16xf32>, vector<16x128xf32>, vector<8x128xf32> -> vector<8x128xf32>
    %c16 = arith.constant 16 : index
    %c0_13 = arith.constant 0 : index
    %14 = vector.load %arg3[%c16, %c0_13] : memref<48x128xf32, #tpu.memory_space<vmem>>, vector<32x128xf32>
    %cst_14 = arith.constant dense<0.000000e+00> : vector<8x128xf32>
    %15 = tpu.matmul %9, %14, %cst_14 {dimension_numbers = #tpu.dot_dimension_numbers<[1], [0], [0], [1], [0, 0, 1, 1], [], []>} : vector<8x32xf32>, vector<32x128xf32>, vector<8x128xf32> -> vector<8x128xf32>
    %16 = arith.addf %13, %15 : vector<8x128xf32>
    %c0_15 = arith.constant 0 : index
    %c0_16 = arith.constant 0 : index
    %17 = vector.load %arg4[%c0_15, %c0_16] : memref<1x128xf32, #tpu.memory_space<vmem>>, vector<1x128xf32>
    %18 = vector.broadcast %17 : vector<1x128xf32> to vector<8x128xf32>
    %19 = arith.addf %16, %18 : vector<8x128xf32>
    %20 = vector.extract_strided_slice %19 {offsets = [0, 0], sizes = [8, 32], strides = [1, 1]} : vector<8x128xf32> to vector<8x32xf32>
    %21 = arith.negf %20 : vector<8x32xf32>
    %22 = math.exp %21 : vector<8x32xf32>
    %cst_17 = arith.constant 1.000000e+00 : f32
    %23 = vector.broadcast %cst_17 : f32 to vector<8x32xf32>
    %24 = arith.addf %23, %22 : vector<8x32xf32>
    %25 = arith.divf %23, %24 : vector<8x32xf32>
    %26 = vector.extract_strided_slice %19 {offsets = [0, 32], sizes = [8, 32], strides = [1, 1]} : vector<8x128xf32> to vector<8x32xf32>
    %27 = arith.negf %26 : vector<8x32xf32>
    %28 = math.exp %27 : vector<8x32xf32>
    %cst_18 = arith.constant 1.000000e+00 : f32
    %29 = vector.broadcast %cst_18 : f32 to vector<8x32xf32>
    %30 = arith.addf %29, %28 : vector<8x32xf32>
    %31 = arith.divf %29, %30 : vector<8x32xf32>
    %32 = vector.extract_strided_slice %19 {offsets = [0, 64], sizes = [8, 32], strides = [1, 1]} : vector<8x128xf32> to vector<8x32xf32>
    %33 = math.tanh %32 : vector<8x32xf32>
    %34 = vector.extract_strided_slice %19 {offsets = [0, 96], sizes = [8, 32], strides = [1, 1]} : vector<8x128xf32> to vector<8x32xf32>
    %35 = arith.negf %34 : vector<8x32xf32>
    %36 = math.exp %35 : vector<8x32xf32>
    %cst_19 = arith.constant 1.000000e+00 : f32
    %37 = vector.broadcast %cst_19 : f32 to vector<8x32xf32>
    %38 = arith.addf %37, %36 : vector<8x32xf32>
    %39 = arith.divf %37, %38 : vector<8x32xf32>
    %40 = arith.mulf %31, %11 : vector<8x32xf32>
    %41 = arith.mulf %25, %33 : vector<8x32xf32>
    %42 = arith.addf %40, %41 : vector<8x32xf32>
    %43 = math.tanh %42 : vector<8x32xf32>
    %44 = arith.mulf %39, %43 : vector<8x32xf32>
    %45 = vector.shape_cast %5 : vector<8x1xi1> to vector<8x1xi1>
    %46 = vector.broadcast %45 : vector<8x1xi1> to vector<8x32xi1>
    %47 = arith.select %46, %44, %9 : vector<8x32xi1>, vector<8x32xf32>
    %48 = vector.shape_cast %5 : vector<8x1xi1> to vector<8x1xi1>
    %49 = vector.broadcast %48 : vector<8x1xi1> to vector<8x32xi1>
    %50 = arith.select %49, %42, %11 : vector<8x32xi1>, vector<8x32xf32>
    %c0_20 = arith.constant 0 : index
    %c0_21 = arith.constant 0 : index
    %c0_22 = arith.constant 0 : index
    %51 = vector.load %arg9[%c0_20, %c0_21, %c0_22] : memref<1x8x32xf32, #tpu.memory_space<vmem>>, vector<1x8x32xf32>
    %52 = vector.shape_cast %51 : vector<1x8x32xf32> to vector<8x32xf32>
    %53 = vector.shape_cast %47 : vector<8x32xf32> to vector<1x8x32xf32>
    tpu.vector_store %arg9[%c0_20, %c0_21, %c0_22], %53 {strides = array<i32>} : memref<1x8x32xf32, #tpu.memory_space<vmem>>, vector<1x8x32xf32>,
    %c0_23 = arith.constant 0 : index
    %c0_24 = arith.constant 0 : index
    %c0_25 = arith.constant 0 : index
    %54 = vector.load %arg10[%c0_23, %c0_24, %c0_25] : memref<1x8x32xf32, #tpu.memory_space<vmem>>, vector<1x8x32xf32>
    %55 = vector.shape_cast %54 : vector<1x8x32xf32> to vector<8x32xf32>
    %56 = vector.shape_cast %50 : vector<8x32xf32> to vector<1x8x32xf32>
    tpu.vector_store %arg10[%c0_23, %c0_24, %c0_25], %56 {strides = array<i32>} : memref<1x8x32xf32, #tpu.memory_space<vmem>>, vector<1x8x32xf32>,
    %c7_i32 = arith.constant 7 : i32
    %57 = arith.cmpi eq, %arg0, %c7_i32 : i32
    %58 = arith.extui %57 : i1 to i32
    %c0_i32_26 = arith.constant 0 : i32
    %59 = arith.cmpi ne, %58, %c0_i32_26 : i32
    scf.if %59 {
      %c0_27 = arith.constant 0 : index
      %c0_28 = arith.constant 0 : index
      %c0_29 = arith.constant 0 : index
      %60 = vector.load %arg9[%c0_27, %c0_28, %c0_29] : memref<1x8x32xf32, #tpu.memory_space<vmem>>, vector<1x8x32xf32>
      %c0_30 = arith.constant 0 : index
      %c0_31 = arith.constant 0 : index
      %c0_32 = arith.constant 0 : index
      %61 = vector.load %arg7[%c0_30, %c0_31, %c0_32] : memref<1x8x32xf32, #tpu.memory_space<vmem>>, vector<1x8x32xf32>
      tpu.vector_store %arg7[%c0_30, %c0_31, %c0_32], %60 {strides = array<i32>} : memref<1x8x32xf32, #tpu.memory_space<vmem>>, vector<1x8x32xf32>,
      %c0_33 = arith.constant 0 : index
      %c0_34 = arith.constant 0 : index
      %c0_35 = arith.constant 0 : index
      %62 = vector.load %arg10[%c0_33, %c0_34, %c0_35] : memref<1x8x32xf32, #tpu.memory_space<vmem>>, vector<1x8x32xf32>
      %c0_36 = arith.constant 0 : index
      %c0_37 = arith.constant 0 : index
      %c0_38 = arith.constant 0 : index
      %63 = vector.load %arg8[%c0_36, %c0_37, %c0_38] : memref<1x8x32xf32, #tpu.memory_space<vmem>>, vector<1x8x32xf32>
      tpu.vector_store %arg8[%c0_36, %c0_37, %c0_38], %62 {strides = array<i32>} : memref<1x8x32xf32, #tpu.memory_space<vmem>>, vector<1x8x32xf32>,
    } else {
    }
    return
  }
  func.func @transform_0(%arg0: i32) -> (i32, i32, i32) {
    %c0_i32 = arith.constant 0 : i32
    %c0_i32_0 = arith.constant 0 : i32
    %c0_i32_1 = arith.constant 0 : i32
    return %arg0, %c0_i32, %c0_i32_0 : i32, i32, i32
  }
  func.func @transform_1(%arg0: i32) -> (i32, i32) {
    %c0_i32 = arith.constant 0 : i32
    %c0_i32_0 = arith.constant 0 : i32
    %c0_i32_1 = arith.constant 0 : i32
    return %c0_i32, %c0_i32_0 : i32, i32
  }
  func.func @transform_2(%arg0: i32) -> (i32, i32) {
    %c0_i32 = arith.constant 0 : i32
    %c0_i32_0 = arith.constant 0 : i32
    %c0_i32_1 = arith.constant 0 : i32
    return %c0_i32, %c0_i32_0 : i32, i32
  }
  func.func @transform_3(%arg0: i32) -> (i32, i32) {
    %c0_i32 = arith.constant 0 : i32
    %c0_i32_0 = arith.constant 0 : i32
    %c0_i32_1 = arith.constant 0 : i32
    return %c0_i32, %c0_i32_0 : i32, i32
  }
  func.func @transform_4(%arg0: i32) -> (i32, i32, i32) {
    %c0_i32 = arith.constant 0 : i32
    %c0_i32_0 = arith.constant 0 : i32
    %c0_i32_1 = arith.constant 0 : i32
    %c0_i32_2 = arith.constant 0 : i32
    return %c0_i32, %c0_i32_0, %c0_i32_1 : i32, i32, i32
  }
  func.func @transform_5(%arg0: i32) -> (i32, i32, i32) {
    %c0_i32 = arith.constant 0 : i32
    %c0_i32_0 = arith.constant 0 : i32
    %c0_i32_1 = arith.constant 0 : i32
    %c0_i32_2 = arith.constant 0 : i32
    return %c0_i32, %c0_i32_0, %c0_i32_1 : i32, i32, i32
  }
  func.func @transform_6(%arg0: i32) -> (i32, i32, i32) {
    %c0_i32 = arith.constant 0 : i32
    %c0_i32_0 = arith.constant 0 : i32
    %c0_i32_1 = arith.constant 0 : i32
    %c0_i32_2 = arith.constant 0 : i32
    return %c0_i32, %c0_i32_0, %c0_i32_1 : i32, i32, i32
  }
  func.func @transform_7(%arg0: i32) -> (i32, i32, i32) {
    %c0_i32 = arith.constant 0 : i32
    %c0_i32_0 = arith.constant 0 : i32
    %c0_i32_1 = arith.constant 0 : i32
    %c0_i32_2 = arith.constant 0 : i32
    return %c0_i32, %c0_i32_0, %c0_i32_1 : i32, i32, i32
  }
}

module attributes {stable_mosaic.version = 11 : i64} {
  func.func @_linear_kernel(%arg0: memref<56x32xf32, #tpu.memory_space<vmem>>, %arg1: memref<32x128xf32, #tpu.memory_space<vmem>>, %arg2: memref<1x128xf32, #tpu.memory_space<vmem>>, %arg3: memref<56x128xf32, #tpu.memory_space<vmem>>) attributes {dimension_semantics = [], scalar_prefetch = 0 : i64, scratch_operands = 0 : i64, tpu.core_type = #tpu.core_type<tc>} {
    %c0 = arith.constant 0 : index
    %c0_0 = arith.constant 0 : index
    %0 = vector.load %arg0[%c0, %c0_0] : memref<56x32xf32, #tpu.memory_space<vmem>>, vector<56x32xf32>
    %c0_1 = arith.constant 0 : index
    %c0_2 = arith.constant 0 : index
    %1 = vector.load %arg1[%c0_1, %c0_2] : memref<32x128xf32, #tpu.memory_space<vmem>>, vector<32x128xf32>
    %cst = arith.constant dense<0.000000e+00> : vector<56x128xf32>
    %2 = tpu.matmul %0, %1, %cst {dimension_numbers = #tpu.dot_dimension_numbers<[1], [0], [0], [1], [0, 0, 1, 1], [], []>} : vector<56x32xf32>, vector<32x128xf32>, vector<56x128xf32> -> vector<56x128xf32>
    %c0_3 = arith.constant 0 : index
    %c0_4 = arith.constant 0 : index
    %3 = vector.load %arg2[%c0_3, %c0_4] : memref<1x128xf32, #tpu.memory_space<vmem>>, vector<1x128xf32>
    %4 = vector.broadcast %3 : vector<1x128xf32> to vector<56x128xf32>
    %5 = arith.addf %2, %4 : vector<56x128xf32>
    %c0_5 = arith.constant 0 : index
    %c0_6 = arith.constant 0 : index
    %6 = vector.load %arg3[%c0_5, %c0_6] : memref<56x128xf32, #tpu.memory_space<vmem>>, vector<56x128xf32>
    tpu.vector_store %arg3[%c0_5, %c0_6], %5 {strides = array<i32>} : memref<56x128xf32, #tpu.memory_space<vmem>>, vector<56x128xf32>,
    return
  }
}

module attributes {stable_mosaic.version = 11 : i64} {
  func.func @kernel(%arg0: i32, %arg1: memref<1x8x16xf32, #tpu.memory_space<vmem>>, %arg2: memref<8x1xi32, #tpu.memory_space<vmem>>, %arg3: memref<48x128xf32, #tpu.memory_space<vmem>>, %arg4: memref<64x128xf32, #tpu.memory_space<vmem>>, %arg5: memref<1x128xf32, #tpu.memory_space<vmem>>, %arg6: memref<1x128xf32, #tpu.memory_space<vmem>>, %arg7: memref<2x8x32xf32, #tpu.memory_space<vmem>>, %arg8: memref<2x8x32xf32, #tpu.memory_space<vmem>>, %arg9: memref<2x8x32xf32, #tpu.memory_space<vmem>>, %arg10: memref<2x8x32xf32, #tpu.memory_space<vmem>>, %arg11: memref<1x8x32xf32, #tpu.memory_space<vmem>>, %arg12: memref<2x8x32xf32, #tpu.memory_space<vmem>>, %arg13: memref<2x8x32xf32, #tpu.memory_space<vmem>>) attributes {dimension_semantics = [#tpu.dimension_semantics<arbitrary>], iteration_bounds = array<i64: 7>, scalar_prefetch = 0 : i64, scratch_operands = 2 : i64, tpu.core_type = #tpu.core_type<tc>, window_params = [{transform_indices = @transform_0, window_bounds = array<i64: 1, 8, 16>}, {pipeline_mode = #tpu.pipeline_mode<synchronous>, transform_indices = @transform_1, window_bounds = array<i64: 8, 1>}, {pipeline_mode = #tpu.pipeline_mode<synchronous>, transform_indices = @transform_2, window_bounds = array<i64: 48, 128>}, {pipeline_mode = #tpu.pipeline_mode<synchronous>, transform_indices = @transform_3, window_bounds = array<i64: 64, 128>}, {pipeline_mode = #tpu.pipeline_mode<synchronous>, transform_indices = @transform_4, window_bounds = array<i64: 1, 128>}, {pipeline_mode = #tpu.pipeline_mode<synchronous>, transform_indices = @transform_5, window_bounds = array<i64: 1, 128>}, {pipeline_mode = #tpu.pipeline_mode<synchronous>, transform_indices = @transform_6, window_bounds = array<i64: 2, 8, 32>}, {pipeline_mode = #tpu.pipeline_mode<synchronous>, transform_indices = @transform_7, window_bounds = array<i64: 2, 8, 32>}, {pipeline_mode = #tpu.pipeline_mode<synchronous>, transform_indices = @transform_8, window_bounds = array<i64: 2, 8, 32>}, {pipeline_mode = #tpu.pipeline_mode<synchronous>, transform_indices = @transform_9, window_bounds = array<i64: 2, 8, 32>}, {transform_indices = @transform_10, window_bounds = array<i64: 1, 8, 32>}]} {
    %c0_i32 = arith.constant 0 : i32
    %0 = arith.cmpi eq, %arg0, %c0_i32 : i32
    %1 = arith.extui %0 : i1 to i32
    %c0_i32_0 = arith.constant 0 : i32
    %2 = arith.cmpi ne, %1, %c0_i32_0 : i32
    scf.if %2 {
      %c0_51 = arith.constant 0 : index
      %c0_52 = arith.constant 0 : index
      %c0_53 = arith.constant 0 : index
      %112 = vector.load %arg7[%c0_51, %c0_52, %c0_53] : memref<2x8x32xf32, #tpu.memory_space<vmem>>, vector<2x8x32xf32>
      %c0_54 = arith.constant 0 : index
      %c0_55 = arith.constant 0 : index
      %c0_56 = arith.constant 0 : index
      %113 = vector.load %arg12[%c0_54, %c0_55, %c0_56] : memref<2x8x32xf32, #tpu.memory_space<vmem>>, vector<2x8x32xf32>
      tpu.vector_store %arg12[%c0_54, %c0_55, %c0_56], %112 {strides = array<i32>} : memref<2x8x32xf32, #tpu.memory_space<vmem>>, vector<2x8x32xf32>,
      %c0_57 = arith.constant 0 : index
      %c0_58 = arith.constant 0 : index
      %c0_59 = arith.constant 0 : index
      %114 = vector.load %arg8[%c0_57, %c0_58, %c0_59] : memref<2x8x32xf32, #tpu.memory_space<vmem>>, vector<2x8x32xf32>
      %c0_60 = arith.constant 0 : index
      %c0_61 = arith.constant 0 : index
      %c0_62 = arith.constant 0 : index
      %115 = vector.load %arg13[%c0_60, %c0_61, %c0_62] : memref<2x8x32xf32, #tpu.memory_space<vmem>>, vector<2x8x32xf32>
      tpu.vector_store %arg13[%c0_60, %c0_61, %c0_62], %114 {strides = array<i32>} : memref<2x8x32xf32, #tpu.memory_space<vmem>>, vector<2x8x32xf32>,
    } else {
    }
    %c0 = arith.constant 0 : index
    %c0_1 = arith.constant 0 : index
    %3 = vector.load %arg2[%c0, %c0_1] : memref<8x1xi32, #tpu.memory_space<vmem>>, vector<8x1xi32>
    %4 = vector.broadcast %arg0 : i32 to vector<8x1xi32>
    %5 = arith.cmpi slt, %4, %3 : vector<8x1xi32>
    %c0_2 = arith.constant 0 : index
    %c0_3 = arith.constant 0 : index
    %c0_4 = arith.constant 0 : index
    %6 = vector.load %arg1[%c0_2, %c0_3, %c0_4] : memref<1x8x16xf32, #tpu.memory_space<vmem>>, vector<1x8x16xf32>
    %7 = vector.shape_cast %6 : vector<1x8x16xf32> to vector<8x16xf32>
    %c0_5 = arith.constant 0 : index
    %c0_6 = arith.constant 0 : index
    %c0_7 = arith.constant 0 : index
    %8 = vector.load %arg12[%c0_5, %c0_6, %c0_7] : memref<2x8x32xf32, #tpu.memory_space<vmem>>, vector<1x8x32xf32>
    %9 = vector.shape_cast %8 : vector<1x8x32xf32> to vector<8x32xf32>
    %c0_8 = arith.constant 0 : index
    %c0_9 = arith.constant 0 : index
    %c0_10 = arith.constant 0 : index
    %10 = vector.load %arg13[%c0_8, %c0_9, %c0_10] : memref<2x8x32xf32, #tpu.memory_space<vmem>>, vector<1x8x32xf32>
    %11 = vector.shape_cast %10 : vector<1x8x32xf32> to vector<8x32xf32>
    %c0_11 = arith.constant 0 : index
    %c0_12 = arith.constant 0 : index
    %12 = vector.load %arg3[%c0_11, %c0_12] : memref<48x128xf32, #tpu.memory_space<vmem>>, vector<16x128xf32>
    %cst = arith.constant dense<0.000000e+00> : vector<8x128xf32>
    %13 = tpu.matmul %7, %12, %cst {dimension_numbers = #tpu.dot_dimension_numbers<[1], [0], [0], [1], [0, 0, 1, 1], [], []>} : vector<8x16xf32>, vector<16x128xf32>, vector<8x128xf32> -> vector<8x128xf32>
    %c16 = arith.constant 16 : index
    %c0_13 = arith.constant 0 : index
    %14 = vector.load %arg3[%c16, %c0_13] : memref<48x128xf32, #tpu.memory_space<vmem>>, vector<32x128xf32>
    %cst_14 = arith.constant dense<0.000000e+00> : vector<8x128xf32>
    %15 = tpu.matmul %9, %14, %cst_14 {dimension_numbers = #tpu.dot_dimension_numbers<[1], [0], [0], [1], [0, 0, 1, 1], [], []>} : vector<8x32xf32>, vector<32x128xf32>, vector<8x128xf32> -> vector<8x128xf32>
    %16 = arith.addf %13, %15 : vector<8x128xf32>
    %c0_15 = arith.constant 0 : index
    %c0_16 = arith.constant 0 : index
    %17 = vector.load %arg5[%c0_15, %c0_16] : memref<1x128xf32, #tpu.memory_space<vmem>>, vector<1x128xf32>
    %18 = vector.broadcast %17 : vector<1x128xf32> to vector<8x128xf32>
    %19 = arith.addf %16, %18 : vector<8x128xf32>
    %20 = vector.extract_strided_slice %19 {offsets = [0, 0], sizes = [8, 32], strides = [1, 1]} : vector<8x128xf32> to vector<8x32xf32>
    %21 = arith.negf %20 : vector<8x32xf32>
    %22 = math.exp %21 : vector<8x32xf32>
    %cst_17 = arith.constant 1.000000e+00 : f32
    %23 = vector.broadcast %cst_17 : f32 to vector<8x32xf32>
    %24 = arith.addf %23, %22 : vector<8x32xf32>
    %25 = arith.divf %23, %24 : vector<8x32xf32>
    %26 = vector.extract_strided_slice %19 {offsets = [0, 32], sizes = [8, 32], strides = [1, 1]} : vector<8x128xf32> to vector<8x32xf32>
    %27 = arith.negf %26 : vector<8x32xf32>
    %28 = math.exp %27 : vector<8x32xf32>
    %cst_18 = arith.constant 1.000000e+00 : f32
    %29 = vector.broadcast %cst_18 : f32 to vector<8x32xf32>
    %30 = arith.addf %29, %28 : vector<8x32xf32>
    %31 = arith.divf %29, %30 : vector<8x32xf32>
    %32 = vector.extract_strided_slice %19 {offsets = [0, 64], sizes = [8, 32], strides = [1, 1]} : vector<8x128xf32> to vector<8x32xf32>
    %33 = math.tanh %32 : vector<8x32xf32>
    %34 = vector.extract_strided_slice %19 {offsets = [0, 96], sizes = [8, 32], strides = [1, 1]} : vector<8x128xf32> to vector<8x32xf32>
    %35 = arith.negf %34 : vector<8x32xf32>
    %36 = math.exp %35 : vector<8x32xf32>
    %cst_19 = arith.constant 1.000000e+00 : f32
    %37 = vector.broadcast %cst_19 : f32 to vector<8x32xf32>
    %38 = arith.addf %37, %36 : vector<8x32xf32>
    %39 = arith.divf %37, %38 : vector<8x32xf32>
    %40 = arith.mulf %31, %11 : vector<8x32xf32>
    %41 = arith.mulf %25, %33 : vector<8x32xf32>
    %42 = arith.addf %40, %41 : vector<8x32xf32>
    %43 = math.tanh %42 : vector<8x32xf32>
    %44 = arith.mulf %39, %43 : vector<8x32xf32>
    %45 = vector.shape_cast %5 : vector<8x1xi1> to vector<8x1xi1>
    %46 = vector.broadcast %45 : vector<8x1xi1> to vector<8x32xi1>
    %47 = arith.select %46, %44, %9 : vector<8x32xi1>, vector<8x32xf32>
    %48 = vector.shape_cast %5 : vector<8x1xi1> to vector<8x1xi1>
    %49 = vector.broadcast %48 : vector<8x1xi1> to vector<8x32xi1>
    %50 = arith.select %49, %42, %11 : vector<8x32xi1>, vector<8x32xf32>
    %c0_20 = arith.constant 0 : index
    %c0_21 = arith.constant 0 : index
    %c0_22 = arith.constant 0 : index
    %51 = vector.load %arg12[%c0_20, %c0_21, %c0_22] : memref<2x8x32xf32, #tpu.memory_space<vmem>>, vector<1x8x32xf32>
    %52 = vector.shape_cast %51 : vector<1x8x32xf32> to vector<8x32xf32>
    %53 = vector.shape_cast %47 : vector<8x32xf32> to vector<1x8x32xf32>
    tpu.vector_store %arg12[%c0_20, %c0_21, %c0_22], %53 {strides = array<i32>} : memref<2x8x32xf32, #tpu.memory_space<vmem>>, vector<1x8x32xf32>,
    %c0_23 = arith.constant 0 : index
    %c0_24 = arith.constant 0 : index
    %c0_25 = arith.constant 0 : index
    %54 = vector.load %arg13[%c0_23, %c0_24, %c0_25] : memref<2x8x32xf32, #tpu.memory_space<vmem>>, vector<1x8x32xf32>
    %55 = vector.shape_cast %54 : vector<1x8x32xf32> to vector<8x32xf32>
    %56 = vector.shape_cast %50 : vector<8x32xf32> to vector<1x8x32xf32>
    tpu.vector_store %arg13[%c0_23, %c0_24, %c0_25], %56 {strides = array<i32>} : memref<2x8x32xf32, #tpu.memory_space<vmem>>, vector<1x8x32xf32>,
    %c1 = arith.constant 1 : index
    %c0_26 = arith.constant 0 : index
    %c0_27 = arith.constant 0 : index
    %57 = vector.load %arg12[%c1, %c0_26, %c0_27] : memref<2x8x32xf32, #tpu.memory_space<vmem>>, vector<1x8x32xf32>
    %58 = vector.shape_cast %57 : vector<1x8x32xf32> to vector<8x32xf32>
    %c1_28 = arith.constant 1 : index
    %c0_29 = arith.constant 0 : index
    %c0_30 = arith.constant 0 : index
    %59 = vector.load %arg13[%c1_28, %c0_29, %c0_30] : memref<2x8x32xf32, #tpu.memory_space<vmem>>, vector<1x8x32xf32>
    %60 = vector.shape_cast %59 : vector<1x8x32xf32> to vector<8x32xf32>
    %c0_31 = arith.constant 0 : index
    %c0_32 = arith.constant 0 : index
    %61 = vector.load %arg4[%c0_31, %c0_32] : memref<64x128xf32, #tpu.memory_space<vmem>>, vector<32x128xf32>
    %cst_33 = arith.constant dense<0.000000e+00> : vector<8x128xf32>
    %62 = tpu.matmul %47, %61, %cst_33 {dimension_numbers = #tpu.dot_dimension_numbers<[1], [0], [0], [1], [0, 0, 1, 1], [], []>} : vector<8x32xf32>, vector<32x128xf32>, vector<8x128xf32> -> vector<8x128xf32>
    %c32 = arith.constant 32 : index
    %c0_34 = arith.constant 0 : index
    %63 = vector.load %arg4[%c32, %c0_34] : memref<64x128xf32, #tpu.memory_space<vmem>>, vector<32x128xf32>
    %cst_35 = arith.constant dense<0.000000e+00> : vector<8x128xf32>
    %64 = tpu.matmul %58, %63, %cst_35 {dimension_numbers = #tpu.dot_dimension_numbers<[1], [0], [0], [1], [0, 0, 1, 1], [], []>} : vector<8x32xf32>, vector<32x128xf32>, vector<8x128xf32> -> vector<8x128xf32>
    %65 = arith.addf %62, %64 : vector<8x128xf32>
    %c0_36 = arith.constant 0 : index
    %c0_37 = arith.constant 0 : index
    %66 = vector.load %arg6[%c0_36, %c0_37] : memref<1x128xf32, #tpu.memory_space<vmem>>, vector<1x128xf32>
    %67 = vector.broadcast %66 : vector<1x128xf32> to vector<8x128xf32>
    %68 = arith.addf %65, %67 : vector<8x128xf32>
    %69 = vector.extract_strided_slice %68 {offsets = [0, 0], sizes = [8, 32], strides = [1, 1]} : vector<8x128xf32> to vector<8x32xf32>
    %70 = arith.negf %69 : vector<8x32xf32>
    %71 = math.exp %70 : vector<8x32xf32>
    %cst_38 = arith.constant 1.000000e+00 : f32
    %72 = vector.broadcast %cst_38 : f32 to vector<8x32xf32>
    %73 = arith.addf %72, %71 : vector<8x32xf32>
    %74 = arith.divf %72, %73 : vector<8x32xf32>
    %75 = vector.extract_strided_slice %68 {offsets = [0, 32], sizes = [8, 32], strides = [1, 1]} : vector<8x128xf32> to vector<8x32xf32>
    %76 = arith.negf %75 : vector<8x32xf32>
    %77 = math.exp %76 : vector<8x32xf32>
    %cst_39 = arith.constant 1.000000e+00 : f32
    %78 = vector.broadcast %cst_39 : f32 to vector<8x32xf32>
    %79 = arith.addf %78, %77 : vector<8x32xf32>
    %80 = arith.divf %78, %79 : vector<8x32xf32>
    %81 = vector.extract_strided_slice %68 {offsets = [0, 64], sizes = [8, 32], strides = [1, 1]} : vector<8x128xf32> to vector<8x32xf32>
    %82 = math.tanh %81 : vector<8x32xf32>
    %83 = vector.extract_strided_slice %68 {offsets = [0, 96], sizes = [8, 32], strides = [1, 1]} : vector<8x128xf32> to vector<8x32xf32>
    %84 = arith.negf %83 : vector<8x32xf32>
    %85 = math.exp %84 : vector<8x32xf32>
    %cst_40 = arith.constant 1.000000e+00 : f32
    %86 = vector.broadcast %cst_40 : f32 to vector<8x32xf32>
    %87 = arith.addf %86, %85 : vector<8x32xf32>
    %88 = arith.divf %86, %87 : vector<8x32xf32>
    %89 = arith.mulf %80, %60 : vector<8x32xf32>
    %90 = arith.mulf %74, %82 : vector<8x32xf32>
    %91 = arith.addf %89, %90 : vector<8x32xf32>
    %92 = math.tanh %91 : vector<8x32xf32>
    %93 = arith.mulf %88, %92 : vector<8x32xf32>
    %94 = vector.shape_cast %5 : vector<8x1xi1> to vector<8x1xi1>
    %95 = vector.broadcast %94 : vector<8x1xi1> to vector<8x32xi1>
    %96 = arith.select %95, %93, %58 : vector<8x32xi1>, vector<8x32xf32>
    %97 = vector.shape_cast %5 : vector<8x1xi1> to vector<8x1xi1>
    %98 = vector.broadcast %97 : vector<8x1xi1> to vector<8x32xi1>
    %99 = arith.select %98, %91, %60 : vector<8x32xi1>, vector<8x32xf32>
    %c1_41 = arith.constant 1 : index
    %c0_42 = arith.constant 0 : index
    %c0_43 = arith.constant 0 : index
    %100 = vector.load %arg12[%c1_41, %c0_42, %c0_43] : memref<2x8x32xf32, #tpu.memory_space<vmem>>, vector<1x8x32xf32>
    %101 = vector.shape_cast %100 : vector<1x8x32xf32> to vector<8x32xf32>
    %102 = vector.shape_cast %96 : vector<8x32xf32> to vector<1x8x32xf32>
    tpu.vector_store %arg12[%c1_41, %c0_42, %c0_43], %102 {strides = array<i32>} : memref<2x8x32xf32, #tpu.memory_space<vmem>>, vector<1x8x32xf32>,
    %c1_44 = arith.constant 1 : index
    %c0_45 = arith.constant 0 : index
    %c0_46 = arith.constant 0 : index
    %103 = vector.load %arg13[%c1_44, %c0_45, %c0_46] : memref<2x8x32xf32, #tpu.memory_space<vmem>>, vector<1x8x32xf32>
    %104 = vector.shape_cast %103 : vector<1x8x32xf32> to vector<8x32xf32>
    %105 = vector.shape_cast %99 : vector<8x32xf32> to vector<1x8x32xf32>
    tpu.vector_store %arg13[%c1_44, %c0_45, %c0_46], %105 {strides = array<i32>} : memref<2x8x32xf32, #tpu.memory_space<vmem>>, vector<1x8x32xf32>,
    %c0_47 = arith.constant 0 : index
    %c0_48 = arith.constant 0 : index
    %c0_49 = arith.constant 0 : index
    %106 = vector.load %arg11[%c0_47, %c0_48, %c0_49] : memref<1x8x32xf32, #tpu.memory_space<vmem>>, vector<1x8x32xf32>
    %107 = vector.shape_cast %106 : vector<1x8x32xf32> to vector<8x32xf32>
    %108 = vector.shape_cast %96 : vector<8x32xf32> to vector<1x8x32xf32>
    tpu.vector_store %arg11[%c0_47, %c0_48, %c0_49], %108 {strides = array<i32>} : memref<1x8x32xf32, #tpu.memory_space<vmem>>, vector<1x8x32xf32>,
    %c6_i32 = arith.constant 6 : i32
    %109 = arith.cmpi eq, %arg0, %c6_i32 : i32
    %110 = arith.extui %109 : i1 to i32
    %c0_i32_50 = arith.constant 0 : i32
    %111 = arith.cmpi ne, %110, %c0_i32_50 : i32
    scf.if %111 {
      %c0_51 = arith.constant 0 : index
      %c0_52 = arith.constant 0 : index
      %c0_53 = arith.constant 0 : index
      %112 = vector.load %arg12[%c0_51, %c0_52, %c0_53] : memref<2x8x32xf32, #tpu.memory_space<vmem>>, vector<2x8x32xf32>
      %c0_54 = arith.constant 0 : index
      %c0_55 = arith.constant 0 : index
      %c0_56 = arith.constant 0 : index
      %113 = vector.load %arg9[%c0_54, %c0_55, %c0_56] : memref<2x8x32xf32, #tpu.memory_space<vmem>>, vector<2x8x32xf32>
      tpu.vector_store %arg9[%c0_54, %c0_55, %c0_56], %112 {strides = array<i32>} : memref<2x8x32xf32, #tpu.memory_space<vmem>>, vector<2x8x32xf32>,
      %c0_57 = arith.constant 0 : index
      %c0_58 = arith.constant 0 : index
      %c0_59 = arith.constant 0 : index
      %114 = vector.load %arg13[%c0_57, %c0_58, %c0_59] : memref<2x8x32xf32, #tpu.memory_space<vmem>>, vector<2x8x32xf32>
      %c0_60 = arith.constant 0 : index
      %c0_61 = arith.constant 0 : index
      %c0_62 = arith.constant 0 : index
      %115 = vector.load %arg10[%c0_60, %c0_61, %c0_62] : memref<2x8x32xf32, #tpu.memory_space<vmem>>, vector<2x8x32xf32>
      tpu.vector_store %arg10[%c0_60, %c0_61, %c0_62], %114 {strides = array<i32>} : memref<2x8x32xf32, #tpu.memory_space<vmem>>, vector<2x8x32xf32>,
    } else {
    }
    return
  }
  func.func @transform_0(%arg0: i32) -> (i32, i32, i32) {
    %c0_i32 = arith.constant 0 : i32
    %c0_i32_0 = arith.constant 0 : i32
    %c0_i32_1 = arith.constant 0 : i32
    return %arg0, %c0_i32, %c0_i32_0 : i32, i32, i32
  }
  func.func @transform_1(%arg0: i32) -> (i32, i32) {
    %c0_i32 = arith.constant 0 : i32
    %c0_i32_0 = arith.constant 0 : i32
    %c0_i32_1 = arith.constant 0 : i32
    return %c0_i32, %c0_i32_0 : i32, i32
  }
  func.func @transform_2(%arg0: i32) -> (i32, i32) {
    %c0_i32 = arith.constant 0 : i32
    %c0_i32_0 = arith.constant 0 : i32
    %c0_i32_1 = arith.constant 0 : i32
    return %c0_i32, %c0_i32_0 : i32, i32
  }
  func.func @transform_3(%arg0: i32) -> (i32, i32) {
    %c0_i32 = arith.constant 0 : i32
    %c0_i32_0 = arith.constant 0 : i32
    %c0_i32_1 = arith.constant 0 : i32
    return %c0_i32, %c0_i32_0 : i32, i32
  }
  func.func @transform_4(%arg0: i32) -> (i32, i32) {
    %c0_i32 = arith.constant 0 : i32
    %c0_i32_0 = arith.constant 0 : i32
    %c0_i32_1 = arith.constant 0 : i32
    return %c0_i32, %c0_i32_0 : i32, i32
  }
  func.func @transform_5(%arg0: i32) -> (i32, i32) {
    %c0_i32 = arith.constant 0 : i32
    %c0_i32_0 = arith.constant 0 : i32
    %c0_i32_1 = arith.constant 0 : i32
    return %c0_i32, %c0_i32_0 : i32, i32
  }
  func.func @transform_6(%arg0: i32) -> (i32, i32, i32) {
    %c0_i32 = arith.constant 0 : i32
    %c0_i32_0 = arith.constant 0 : i32
    %c0_i32_1 = arith.constant 0 : i32
    %c0_i32_2 = arith.constant 0 : i32
    return %c0_i32, %c0_i32_0, %c0_i32_1 : i32, i32, i32
  }
  func.func @transform_7(%arg0: i32) -> (i32, i32, i32) {
    %c0_i32 = arith.constant 0 : i32
    %c0_i32_0 = arith.constant 0 : i32
    %c0_i32_1 = arith.constant 0 : i32
    %c0_i32_2 = arith.constant 0 : i32
    return %c0_i32, %c0_i32_0, %c0_i32_1 : i32, i32, i32
  }
  func.func @transform_8(%arg0: i32) -> (i32, i32, i32) {
    %c0_i32 = arith.constant 0 : i32
    %c0_i32_0 = arith.constant 0 : i32
    %c0_i32_1 = arith.constant 0 : i32
    %c0_i32_2 = arith.constant 0 : i32
    return %c0_i32, %c0_i32_0, %c0_i32_1 : i32, i32, i32
  }
  func.func @transform_9(%arg0: i32) -> (i32, i32, i32) {
    %c0_i32 = arith.constant 0 : i32
    %c0_i32_0 = arith.constant 0 : i32
    %c0_i32_1 = arith.constant 0 : i32
    %c0_i32_2 = arith.constant 0 : i32
    return %c0_i32, %c0_i32_0, %c0_i32_1 : i32, i32, i32
  }
  func.func @transform_10(%arg0: i32) -> (i32, i32, i32) {
    %c0_i32 = arith.constant 0 : i32
    %c0_i32_0 = arith.constant 0 : i32
    %c0_i32_1 = arith.constant 0 : i32
    return %arg0, %c0_i32, %c0_i32_0 : i32, i32, i32
  }
}

</mosaic_0001>

<bundles_post_ra>
// kernel: seq2seq_forward.5
= control target key start
LH: loop header
LB: loop body
LE: loop exit
PB: predicated region body
PF: predicated region fallthrough
CT: control target
= control target key end

     0   :  { %vm29_vm0 = vcmask 261120   ;;  %s204_s1 = inlined_call_operand.vmem [shape: f32[32,128], index: 1, kind: input, shape index: {}]   ;;  %s205_s0 = inlined_call_operand.vmem [shape: f32[56,32], index: 0, kind: input, shape index: {}]   ;;  %s206_s2 = inlined_call_operand.vmem [shape: f32[1,128], index: 2, kind: input, shape index: {}]   ;;  %s207_s3 = inlined_call_operand.vmem [shape: f32[56,128], index: 3, kind: output, shape index: {}]  }
   0x1   :  { %v24_v0 = vld [vmem:[%s204_s1 + $0x18] sm:$0xff]  ;;  %v23_v1 = vld [vmem:[%s204_s1 + $0x10] sm:$0xff]  ;;  %v22_v2 = vld [vmem:[%s204_s1 + $0x8] sm:$0xff] }
   0x2   :  { %109 = vmatpush.msra.mxu3 %v24_v0  ;;  %63 = vmatpush.msra.mxu0 %v24_v0  ;;  %v21_v3 = vld [vmem:[%s204_s1] sm:$0xff]  ;;  %v19_v4 = vld [vmem:[%s205_s0 + $0x28] sm:$0xff]  ;;  %v16_v6 = vld [vmem:[%s205_s0 + $0x10] sm:$0xff] }
   0x3   :  { %107 = vmatpush.msra.mxu1 %v24_v0  ;;  %108 = vmatpush.msra.mxu2 %v24_v0  ;;  %v14_v5 = vld [vmem:[%s205_s0] sm:$0xff]  ;;  %v20_v8 = vld [vmem:[%s205_s0 + $0x30] sm:$0xff]  ;;  %v15_v9 = vld [vmem:[%s205_s0 + $0x8] sm:$0xff] }
   0x4   :  { %112 = vmatpush.msra.mxu3 %v23_v1  ;;  %64 = vmatpush.msra.mxu0 %v23_v1  ;;  %v18_v7 = vld [vmem:[%s205_s0 + $0x20] sm:$0xff]  ;;  %v17_v10 = vld [vmem:[%s205_s0 + $0x18] sm:$0xff] }
   0x5   :  { %110 = vmatpush.msra.mxu1 %v23_v1  ;;  %111 = vmatpush.msra.mxu2 %v23_v1  ;;  %v119_v11 = vld [vmem:[%s206_s2] ss:$0 sm:$0xff] }
   0x6   :  { %115 = vmatpush.msra.mxu3 %v22_v2  ;;  %65 = vmatpush.msra.mxu0 %v22_v2 }
   0x7   :  { %113 = vmatpush.msra.mxu1 %v22_v2  ;;  %114 = vmatpush.msra.mxu2 %v22_v2 }
   0x8   :  { %118 = vmatpush.msra.mxu3 %v21_v3  ;;  %66 = vmatpush.msra.mxu0 %v21_v3 }
   0x9   :  { %105 = vmatmul.msk.f32.vlgmr.msra.gmra.mxu3 %vm29_vm0, %v19_v4  ;;  %116 = vmatpush.msra.mxu1 %v21_v3 }
   0xa   :  { %100 = vmatmul.msk.f32.vlgmr.msra.gmra.mxu0 %vm29_vm0, %v14_v5  ;;  %102 = vmatmul.msk.f32.vlgmr.msra.gmra.mxu1 %vm29_vm0, %v16_v6 }
   0xb   :  { %117 = vmatpush.msra.mxu2 %v21_v3 }
   0xc   :  { %104 = vmatmul.msk.f32.vlgmr.msra.gmra.mxu2 %vm29_vm0, %v18_v7 }
  0x11   :  { %106 = vmatmul.msk.f32.gmra.mxu3 %vm29_vm0, %v20_v8 }
  0x12   :  { %101 = vmatmul.msk.f32.gmra.mxu0 %vm29_vm0, %v15_v9  ;;  %103 = vmatmul.msk.f32.gmra.mxu1 %vm29_vm0, %v17_v10 }
  0x87   :  { %v68_v12 = vpop.f32.mrf.mxu0  ;;  %v74_v13 = vpop.f32.mrf.mxu1 }
  0x88   :  { %v69_v14 = vadd.f32 %v119_v11, %v68_v12  ;;  %v75_v15 = vadd.f32 %v119_v11, %v74_v13 }
  0x8a   :  { %89 = vst [vmem:[%s207_s3] sm:$0xff] %v69_v14 }
  0x8b   :  { %91 = vst [vmem:[%s207_s3 + $0x10] sm:$0xff] %v75_v15 }
  0x8c   :  { %v83_v16 = vpop.f32.mrf.mxu3 }
  0x8d   :  { %v84_v17 = vadd.f32 %v119_v11, %v83_v16 }
  0x8f   :  { %94 = vst [vmem:[%s207_s3 + $0x28] sm:$0xff] %v84_v17  ;;  %v71_v18 = vpop.f32.mrf.mxu0  ;;  %v77_v19 = vpop.f32.mrf.mxu1 }
  0x90   :  { %v72_v20 = vadd.f32 %v119_v11, %v71_v18  ;;  %v78_v21 = vadd.f32 %v119_v11, %v77_v19  ;;  %v80_v22 = vpop.f32.mrf.mxu2 }
  0x91   :  { %v81_v23 = vadd.f32 %v119_v11, %v80_v22 }
  0x92   :  { %90 = vst [vmem:[%s207_s3 + $0x8] sm:$0xff] %v72_v20 }
  0x93   :  { %92 = vst [vmem:[%s207_s3 + $0x18] sm:$0xff] %v78_v21 }
  0x94   :  { %93 = vst [vmem:[%s207_s3 + $0x20] sm:$0xff] %v81_v23  ;;  %v86_v24 = vpop.f32.mrf.mxu3 }
  0x95   :  { %v87_v25 = vadd.f32 %v119_v11, %v86_v24 }
  0x97   :  { %95 = vst [vmem:[%s207_s3 + $0x30] sm:$0xff] %v87_v25 }

// kernel: seq2seq_forward.3
= control target key start
LH: loop header
LB: loop body
LE: loop exit
PB: predicated region body
PF: predicated region fallthrough
CT: control target
= control target key end

     0   :  { %s523_s24 = smov 0   ;;  %s590_s0 = inlined_call_operand.vmem [shape: f32[8,8,16], index: 0, kind: input, shape index: {}]   ;;  %s591_s1 = inlined_call_operand.vmem [shape: s32[8,1], index: 1, kind: input, shape index: {}]   ;;  %s592_s2 = inlined_call_operand.vmem [shape: f32[48,128], index: 2, kind: input, shape index: {}]   ;;  %s593_s3 = inlined_call_operand.vmem [shape: f32[1,128], index: 3, kind: input, shape index: {}]   ;;  %s594_s4 = inlined_call_operand.vmem [shape: f32[1,8,32], index: 4, kind: input, shape index: {}, may-alias: {4,5}]   ;;  %s595_s5 = inlined_call_operand.vmem [shape: f32[1,8,32], index: 5, kind: input, shape index: {}, may-alias: {4,5}]   ;;  %s596_s6 = inlined_call_operand.vmem [shape: f32[1,8,32], index: 6, kind: output, shape index: {0}]   ;;  %s597_s7 = inlined_call_operand.vmem [shape: f32[1,8,32], index: 7, kind: output, shape index: {1}]  }
   0x1 LB: > { %s529_s25 = sadd.s32 4294967295, %s477_s24   ;;  %p439_p0 = scmp.ge.s32.totalorder %s477_s24, 1  ;;  %s477_s24 = sphi %s523_s24, %s18_s24  }
   0x2   : > { %p229_p1 = scmp.lt.s32.totalorder %s477_s24, 9 }
   0x4   : > { %p230_p2 = pnand %p439_p0, %p229_p1 }
   0x5   : > { %p255_p3 = scmp.lt.s32.totalorder (!%p230_p2), %s529_s25, 7  ;;  %p441_p4 = scmp.ne.s32.totalorder (!%p230_p2), %s529_s25, 0 }
   0x6   : > { %233 = sbr.rel (%p230_p2) target bundleno = 648 (0x288), region = 44 }
   0xb   : > { %s256_s26 = scalar_select %p255_p3, %s529_s25, 7 }
   0xc   : > { %262 = sbr.rel (%p441_p4) target bundleno = 20 (0x14), region = 48 }
   0xd   : > { %s440_s27 = sshll.u32 %s256_s26, 3 }
   0xe   : > { %s258_s30 = scalar_lea.vmem %s590_s0, %s440_s27 }
  0x11   : > { %v263_v0 = vld [vmem:[%s594_s4] sm:$0xff]  ;;  %vm264_vm0 = vcmask 261120  }
  0x12   : > { %v266_v1 = vld [vmem:[%s595_s5] sm:$0xff]  ;;  %265 = vst.msk [vmem:[#allocation2] sm:$0xff] %vm264_vm0, %v263_v0 }
  0x13   : > { %267 = vst.msk [vmem:[#allocation3] sm:$0xff] %vm264_vm0, %v266_v1 }
  0x14 PF: > { %v279_v2 = vld [vmem:[%s592_s2 + $0x28] sm:$0xff]  ;;  %v278_v3 = vld [vmem:[%s592_s2 + $0x20] sm:$0xff]  ;;  %v277_v6 = vld [vmem:[%s592_s2 + $0x18] sm:$0xff]  ;;  %vm304_vm1 = vcmask 130048   ;;  %vm280_vm2 = vcmask 261120   ;;  %s479_s28 = smov 64   ;;  %v269_v21 = vstv %s529_s25 }
  0x15   : > { %296 = vmatpush.msra.mxu0 %v279_v2  ;;  %v275_v4 = vld [vmem:[%s592_s2 + $0x8] sm:$0xff]  ;;  %v274_v5 = vld [vmem:[%s592_s2] sm:$0xff]  ;;  %v276_v8 = vld [vmem:[%s592_s2 + $0x10] sm:$0xff]  ;;  %s480_s29 = smov 32   ;;  %v481_v23 = vmov 0   ;;  %s482_s9 = smov 96  }
  0x16   : > { %322 = vmatpush.msra.mxu1 %v275_v4  ;;  %v271_v7 = vld [vmem:[%s258_s30] sm:$0xff]  ;;  %460 = vset.pattern.permute.xlu2 %v481_v23  ;;  %p445_p5 = scmp.ne.s32.totalorder %s529_s25, 7 }
  0x17   : > { %297 = vmatpush.msra.mxu0 %v278_v3  ;;  %v462_v11 = vld [vmem:[%s593_s3] ss:$0 sm:$0xff]  ;;  %461 = vset.pattern.permute.xlu0 %v481_v23 }
  0x18   : > { %323 = vmatpush.msra.mxu1 %v274_v5  ;;  %v268_v20 = vld [vmem:[%s591_s1] sm:$0xff] }
  0x19   : > { %298 = vmatpush.msra.mxu0 %v277_v6  ;;  %v272_v9 = vld [vmem:[#allocation2] sm:$0xff]  ;;  %443 = vmatmul.msk.f32.vlgmr.msra.gmra.mxu1 %vm304_vm1, %v271_v7  ;;  %vm270_vm3 = vcmp.lt.s32.totalorder %v269_v21, %v268_v20 }
  0x1a   : > { %v273_v16 = vld [vmem:[#allocation3] sm:$0xff]  ;;  %v374_v24 = vsel %vm270_vm3, 1, %v481_v23 }
  0x1b   : > { %299 = vmatpush.msra.mxu0 %v276_v8  ;;  %376 = vperm.xlu2 %460, %v374_v24  }
  0x1c   : > { %442 = vmatmul.msk.f32.vlgmr.msra.gmra.mxu0 %vm280_vm2, %v272_v9 }
  0x23   : > { %379 = vrot.lane.b32.xlu2 %v272_v9, %s482_s9 }
  0x75   : > { %v377_v41 = vpop.permute.xlu2 %376 }
  0x76   : > { %vm378_vm8 = vcmp.eq.s32.totalorder %v377_v41, 1 }
  0x7d   : > { %v380_v44 = vpop.permute.xlu2 %379 }
  0x96   : > { %v325_v10 = vpop.f32.mrf.mxu1 }
  0x99   : > { %v301_v12 = vpop.f32.mrf.mxu0 }
  0x9a   : > { %v326_v13 = vadd.f32 %v325_v10, %v301_v12 }
  0x9c   : > { %v332_v14 = vadd.f32 %v462_v11, %v326_v13 }
  0x9e   : > { %463 = vtanh.f32 %v332_v14  ;;  %v444_v17 = vmul.f32 -1.442695, %v332_v14 }
  0xa0   : > { %465 = vpow2.f32 %v444_v17 }
  0xa4   : > { %v464_v15 = vpop.eup %463 }
  0xa5   : > { %359 = vrot.lane.b32.xlu0 %v464_v15, %s479_s28 }
  0xa6   : > { %v466_v18 = vpop.eup %465 }
  0xa7   : > { %v336_v19 = vadd.f32 1.0, %v466_v18 }
  0xa9   : > { %467 = vrcp.f32 %v336_v19  ;;  %v348_v29 = vand.u32 2147483648, %v336_v19  ;;  %vm342_vm5 = vweird.f32 %v336_v19  ;;  %v346_v30 = vand.u32 2147483647, %v336_v19 }
  0xab   : > { %v349_v32 = vor.u32 1.1754944e-38, %v348_v29  ;;  %vm347_vm7 = vcmp.eq.f32.partialorder %v346_v30, 8.507059e+37 }
  0xad   : > { %354 = vrot.lane.b32.xlu0 %v273_v16, %s480_s29 }
  0xaf   : > { %v468_v22 = vpop.eup %467 }
  0xb0   : > { %v338_v25 = vmul.f32 %v468_v22, %v336_v19  ;;  %vm343_vm4 = vweird.f32 %v468_v22 }
  0xb1   : > { %vm344_vm6 = vmor %vm342_vm5, %vm343_vm4 }
  0xb2   : > { %v339_v26 = vsub.f32 1.0, %v338_v25 }
  0xb4   : > { %v340_v27 = vmul.f32 %v468_v22, %v339_v26 }
  0xb6   : > { %v341_v28 = vadd.f32 %v468_v22, %v340_v27 }
  0xb8   : > { %v345_v31 = vsel %vm344_vm6, %v468_v22, %v341_v28 }
  0xb9   : > { %v350_v34 = vsel %vm347_vm7, %v349_v32, %v345_v31 }
 0x117   : > { %v360_v33 = vpop.permute.xlu0 %359 }
 0x118   : > { %v362_v35 = vmul.f32 %v360_v33, %v350_v34 }
 0x11a   : > { %364 = vrot.lane.b32.xlu1 %v362_v35, %s480_s29 }
 0x11f   : > { %v355_v36 = vpop.permute.xlu0 %354 }
 0x120   : > { %v357_v37 = vmul.f32 %v355_v36, %v350_v34 }
 0x18c   : > { %v365_v38 = vpop.permute.xlu1 %364 }
 0x18d   : > { %v367_v39 = vadd.f32 %v365_v38, %v357_v37 }
 0x18f   : > { %469 = vtanh.f32 %v367_v39  ;;  %v383_v42 = vsel %vm378_vm8, %v367_v39, %v355_v36 }
 0x195   : > { %v470_v40 = vpop.eup %469 }
 0x196   : > { %370 = vrot.lane.b32.xlu1 %v470_v40, %s479_s28 }
 0x19e   : > { %390 = vrot.lane.b32.xlu1 %v383_v42, %s482_s9 }
 0x208   : > { %v371_v43 = vpop.permute.xlu1 %370 }
 0x209   : > { %v373_v45 = vmul.f32 %v371_v43, %v350_v34 }
 0x20b   : > { %v382_v46 = vsel %vm378_vm8, %v373_v45, %v380_v44 }
 0x20c   : > { %385 = vrot.lane.b32.xlu0 %v382_v46, %s480_s29 }
 0x210   : > { %v391_v47 = vpop.permute.xlu1 %390 }
 0x211   : > { %393 = vst.msk [vmem:[#allocation3] sm:$0xff] %vm280_vm2, %v391_v47 }
 0x27b   : > { %397 = sbr.rel (%p445_p5) target bundleno = 648 (0x288), region = 52 }
 0x27e   : > { %v386_v48 = vpop.permute.xlu0 %385 }
 0x27f   : > { %388 = vst.msk [vmem:[#allocation2] sm:$0xff] %vm280_vm2, %v386_v48 }
 0x280   : > { %v400_v50 = vld [vmem:[#allocation3] sm:$0xff] }
 0x281   : > { %401 = vst.msk [vmem:[%s597_s7] sm:$0xff] %vm280_vm2, %v400_v50 }
 0x286   : > { %v398_v49 = vld [vmem:[#allocation2] sm:$0xff] }
 0x287   : > { %399 = vst.msk [vmem:[%s596_s6] sm:$0xff] %vm280_vm2, %v398_v49 }
 0x288 PF: > { %s18_s24 = sadd.s32 1, %s477_s24  }
 0x289   : > { %p15_p6 = scmp.ge.s32.totalorder %s18_s24, 10  }
 0x28b   :  { %17 = sbr.rel (!%p15_p6) target bundleno = 1 (0x1), region = 86 }

// kernel: seq2seq_forward.4
= control target key start
LH: loop header
LB: loop body
LE: loop exit
PB: predicated region body
PF: predicated region fallthrough
CT: control target
= control target key end

     0   :  { %16 = vsyncpa [#allocation5], 0  ;;  %s1087_s0 = inlined_call_operand.vmem [shape: f32[7,8,16], index: 0, kind: input, shape index: {}]   ;;  %s1088_s1 = inlined_call_operand.vmem [shape: s32[8,1], index: 1, kind: input, shape index: {}]   ;;  %s1089_s2 = inlined_call_operand.vmem [shape: f32[48,128], index: 2, kind: input, shape index: {}]   ;;  %s1090_s3 = inlined_call_operand.vmem [shape: f32[64,128], index: 3, kind: input, shape index: {}]   ;;  %s1091_s4 = inlined_call_operand.vmem [shape: f32[1,128], index: 4, kind: input, shape index: {}]   ;;  %s1092_s5 = inlined_call_operand.vmem [shape: f32[1,128], index: 5, kind: input, shape index: {}]   ;;  %s1093_s6 = inlined_call_operand.vmem [shape: f32[2,8,32], index: 6, kind: input, shape index: {}]   ;;  %s1094_s7 = inlined_call_operand.vmem [shape: f32[2,8,32], index: 7, kind: input, shape index: {}]   ;;  %s1095_s8 = inlined_call_operand.hbm [shape: f32[2,8,32], index: 8, kind: output, shape index: {0}]   ;;  %s1096_s9 = inlined_call_operand.hbm [shape: f32[2,8,32], index: 9, kind: output, shape index: {1}]   ;;  %s1097_s10 = inlined_call_operand.vmem [shape: f32[7,8,32], index: 10, kind: output, shape index: {2}]  }
   0x1   :  { %17 = vsyncpa [#allocation7], 0  ;;  %s933_s13 = smov 0  }
   0x2 LB: > { %s939_s14 = sadd.s32 4294967295, %s868_s13   ;;  %p733_p0 = scmp.ge.s32.totalorder %s868_s13, 1  ;;  %s868_s13 = sphi %s933_s13, %s23_s13  }
   0x3   : > { %p308_p1 = scmp.lt.s32.totalorder %s868_s13, 8 }
   0x5   : > { %p309_p2 = pnand %p733_p0, %p308_p1 }
   0x6   : > { %p344_p3 = scmp.lt.s32.totalorder (!%p309_p2), %s939_s14, 6  ;;  %p736_p4 = scmp.ne.s32.totalorder (!%p309_p2), %s939_s14, 0 }
   0x7   : > { %312 = sbr.rel (%p309_p2) target bundleno = 1279 (0x4ff), region = 52 }
   0xc   : > { %s345_s15 = scalar_select %p344_p3, %s939_s14, 6 }
   0xd   : > { %355 = sbr.rel (%p736_p4) target bundleno = 23 (0x17), region = 56 }
   0xe   : > { %s734_s16 = sshll.u32 %s345_s15, 3 }
   0xf   : > { %s347_s19 = scalar_lea.vmem %s1087_s0, %s734_s16  ;;  %s951_s22 = scalar_lea.vmem %s1097_s10, %s734_s16 }
  0x12   : > { %v356_v0 = vld [vmem:[%s1093_s6] sm:$0xff]  ;;  %vm358_vm0 = vcmask 261120   ;;  %v357_v1 = vld [vmem:[%s1093_s6 + $0x8] sm:$0xff] }
  0x13   : > { %v361_v2 = vld [vmem:[%s1094_s7] sm:$0xff]  ;;  %359 = vst.msk [vmem:[#allocation2] sm:$0xff] %vm358_vm0, %v356_v0  ;;  %v362_v3 = vld [vmem:[%s1094_s7 + $0x8] sm:$0xff] }
  0x14   : > { %360 = vst.msk [vmem:[#allocation2 + $0x8] sm:$0xff] %vm358_vm0, %v357_v1 }
  0x15   : > { %363 = vst.msk [vmem:[#allocation3] sm:$0xff] %vm358_vm0, %v361_v2 }
  0x16   : > { %364 = vst.msk [vmem:[#allocation3 + $0x8] sm:$0xff] %vm358_vm0, %v362_v3 }
  0x17 PF: > { %v376_v4 = vld [vmem:[%s1089_s2 + $0x28] sm:$0xff]  ;;  %v375_v5 = vld [vmem:[%s1089_s2 + $0x20] sm:$0xff]  ;;  %v374_v8 = vld [vmem:[%s1089_s2 + $0x18] sm:$0xff]  ;;  %vm401_vm1 = vcmask 130048   ;;  %vm377_vm2 = vcmask 261120   ;;  %s871_s29 = smov 32   ;;  %v366_v23 = vstv %s939_s14 }
  0x18   : > { %393 = vmatpush.msra.mxu0 %v376_v4  ;;  %v372_v6 = vld [vmem:[%s1089_s2 + $0x8] sm:$0xff]  ;;  %v371_v7 = vld [vmem:[%s1089_s2] sm:$0xff]  ;;  %v373_v10 = vld [vmem:[%s1089_s2 + $0x10] sm:$0xff]  ;;  %v872_v25 = vmov 0   ;;  %s873_s12 = smov 96   ;;  %p743_p5 = scmp.ne.s32.totalorder %s939_s14, 6 }
  0x19   : > { %419 = vmatpush.msra.mxu1 %v372_v6  ;;  %v368_v9 = vld [vmem:[%s347_s19] sm:$0xff]  ;;  %s870_s19 = smov 64   ;;  %778 = vset.pattern.permute.xlu2 %v872_v25  ;;  %v502_v43 = vld [vmem:[%s1090_s3 + $0x38] sm:$0xff]  ;;  %v501_v45 = vld [vmem:[%s1090_s3 + $0x30] sm:$0xff] }
  0x1a   : > { %394 = vmatpush.msra.mxu0 %v375_v5  ;;  %v369_v11 = vld [vmem:[#allocation2] sm:$0xff]  ;;  %779 = vset.pattern.permute.xlu0 %v872_v25  ;;  %v498_v44 = vld [vmem:[%s1090_s3 + $0x18] sm:$0xff]  ;;  %v497_v46 = vld [vmem:[%s1090_s3 + $0x10] sm:$0xff] }
  0x1b   : > { %420 = vmatpush.msra.mxu1 %v371_v7  ;;  %v780_v13 = vld [vmem:[%s1091_s4] ss:$0 sm:$0xff]  ;;  %518 = vmatpush.msra.mxu2 %v502_v43  ;;  %v500_v47 = vld [vmem:[%s1090_s3 + $0x28] sm:$0xff] }
  0x1c   : > { %395 = vmatpush.msra.mxu0 %v374_v8  ;;  %738 = vmatmul.msk.f32.vlgmr.msra.gmra.mxu1 %vm401_vm1, %v368_v9  ;;  %v370_v18 = vld [vmem:[#allocation3] sm:$0xff]  ;;  %v365_v22 = vld [vmem:[%s1088_s1] sm:$0xff]  ;;  %v496_v48 = vld [vmem:[%s1090_s3 + $0x8] sm:$0xff] }
  0x1d   : > { %vm367_vm3 = vcmp.lt.s32.totalorder %v366_v23, %v365_v22  ;;  %540 = vmatpush.msra.mxu3 %v498_v44  ;;  %519 = vmatpush.msra.mxu2 %v501_v45  ;;  %v499_v49 = vld [vmem:[%s1090_s3 + $0x20] sm:$0xff]  ;;  %v492_v56 = vld [vmem:[#allocation2 + $0x8] sm:$0xff]  ;;  %v494_v57 = vld [vmem:[#allocation3 + $0x8] sm:$0xff] }
  0x1e   : > { %396 = vmatpush.msra.mxu0 %v373_v10  ;;  %v471_v26 = vsel %vm367_vm3, 1, %v872_v25  ;;  %v495_v50 = vld [vmem:[%s1090_s3] sm:$0xff] }
  0x1f   : > { %737 = vmatmul.msk.f32.vlgmr.msra.gmra.mxu0 %vm377_vm2, %v369_v11  ;;  %473 = vperm.xlu2 %778, %v471_v26   ;;  %v781_v60 = vld [vmem:[%s1092_s5] ss:$0 sm:$0xff] }
  0x20   : > { %541 = vmatpush.msra.mxu3 %v497_v46  ;;  %520 = vmatpush.msra.mxu2 %v500_v47 }
  0x22   : > { %542 = vmatpush.msra.mxu3 %v496_v48  ;;  %521 = vmatpush.msra.mxu2 %v499_v49 }
  0x23   : > { %740 = vmatmul.msk.f32.vlgmr.msra.gmra.mxu2 %vm377_vm2, %v492_v56 }
  0x24   : > { %543 = vmatpush.msra.mxu3 %v495_v50 }
  0x27   : > { %476 = vrot.lane.b32.xlu2 %v369_v11, %s873_s12 }
  0x2f   : > { %574 = vrot.lane.b32.xlu2 %v494_v57, %s871_s29 }
  0x37   : > { %594 = vrot.lane.b32.xlu2 %v492_v56, %s873_s12 }
  0x79   : > { %v1027_v51 = vpop.permute.xlu2 %473 }
  0x7a   : > { %vm475_vm8 = vcmp.eq.s32.totalorder %v1027_v51, 1 }
  0x81   : > { %v477_v53 = vpop.permute.xlu2 %476 }
  0x99   : > { %v422_v12 = vpop.f32.mrf.mxu1 }
  0x9c   : > { %v398_v14 = vpop.f32.mrf.mxu0 }
  0x9d   : > { %v423_v15 = vadd.f32 %v422_v12, %v398_v14 }
  0x9f   : > { %v429_v16 = vadd.f32 %v780_v13, %v423_v15 }
  0xa1   : > { %782 = vtanh.f32 %v429_v16  ;;  %v739_v19 = vmul.f32 -1.442695, %v429_v16 }
  0xa3   : > { %784 = vpow2.f32 %v739_v19 }
  0xa6   : > { %v523_v59 = vpop.f32.mrf.mxu2 }
  0xa7   : > { %v783_v17 = vpop.eup %782 }
  0xa8   : > { %456 = vrot.lane.b32.xlu0 %v783_v17, %s870_s19  ;;  %v575_v17 = vpop.permute.xlu2 %574 }
  0xa9   : > { %v785_v20 = vpop.eup %784 }
  0xaa   : > { %v433_v21 = vadd.f32 1.0, %v785_v20 }
  0xac   : > { %786 = vrcp.f32 %v433_v21  ;;  %v445_v31 = vand.u32 2147483648, %v433_v21  ;;  %vm439_vm5 = vweird.f32 %v433_v21  ;;  %v443_v32 = vand.u32 2147483647, %v433_v21 }
  0xae   : > { %v446_v34 = vor.u32 1.1754944e-38, %v445_v31  ;;  %vm444_vm7 = vcmp.eq.f32.partialorder %v443_v32, 8.507059e+37 }
  0xb0   : > { %451 = vrot.lane.b32.xlu0 %v370_v18, %s871_s29 }
  0xb2   : > { %v787_v24 = vpop.eup %786 }
  0xb3   : > { %v435_v27 = vmul.f32 %v787_v24, %v433_v21  ;;  %vm440_vm4 = vweird.f32 %v787_v24 }
  0xb4   : > { %vm441_vm6 = vmor %vm439_vm5, %vm440_vm4 }
  0xb5   : > { %v436_v28 = vsub.f32 1.0, %v435_v27 }
  0xb7   : > { %v437_v29 = vmul.f32 %v787_v24, %v436_v28 }
  0xb9   : > { %v438_v30 = vadd.f32 %v787_v24, %v437_v29 }
  0xbb   : > { %v442_v33 = vsel %vm441_vm6, %v787_v24, %v438_v30  ;;  %v595_v24 = vpop.permute.xlu2 %594 }
  0xbc   : > { %v447_v36 = vsel %vm444_vm7, %v446_v34, %v442_v33 }
 0x11a   : > { %v457_v35 = vpop.permute.xlu0 %456 }
 0x11b   : > { %v459_v37 = vmul.f32 %v457_v35, %v447_v36 }
 0x11d   : > { %461 = vrot.lane.b32.xlu1 %v459_v37, %s871_s29 }
 0x122   : > { %v996_v38 = vpop.permute.xlu0 %451 }
 0x123   : > { %v454_v39 = vmul.f32 %v996_v38, %v447_v36 }
 0x18f   : > { %v462_v40 = vpop.permute.xlu1 %461 }
 0x190   : > { %v999_v41 = vadd.f32 %v462_v40, %v454_v39 }
 0x192   : > { %788 = vtanh.f32 %v999_v41  ;;  %v480_v16 = vsel %vm475_vm8, %v999_v41, %v996_v38 }
 0x198   : > { %v789_v42 = vpop.eup %788 }
 0x199   : > { %467 = vrot.lane.b32.xlu1 %v789_v42, %s870_s19 }
 0x20b   : > { %v468_v52 = vpop.permute.xlu1 %467 }
 0x20c   : > { %v470_v54 = vmul.f32 %v468_v52, %v447_v36 }
 0x20e   : > { %v479_v55 = vsel %vm475_vm8, %v470_v54, %v477_v53 }
 0x20f   : > { %482 = vrot.lane.b32.xlu0 %v479_v55, %s871_s29 }
 0x281   : > { %v483_v58 = vpop.permute.xlu0 %482 }
 0x282   : > { %485 = vst.msk [vmem:[#allocation2] sm:$0xff] %vm377_vm2, %v483_v58  ;;  %741 = vmatmul.msk.f32.vlgmr.msra.gmra.mxu3 %vm377_vm2, %v483_v58 }
 0x305   : > { %v545_v61 = vpop.f32.mrf.mxu3 }
 0x306   : > { %v546_v62 = vadd.f32 %v545_v61, %v523_v59 }
 0x308   : > { %v552_v63 = vadd.f32 %v781_v60, %v546_v62 }
 0x30a   : > { %790 = vtanh.f32 %v552_v63  ;;  %v742_v1 = vmul.f32 -1.442695, %v552_v63 }
 0x30c   : > { %792 = vpow2.f32 %v742_v1 }
 0x310   : > { %v791_v0 = vpop.eup %790 }
 0x311   : > { %579 = vrot.lane.b32.xlu1 %v791_v0, %s870_s19 }
 0x312   : > { %v793_v2 = vpop.eup %792 }
 0x313   : > { %v556_v3 = vadd.f32 1.0, %v793_v2 }
 0x315   : > { %794 = vrcp.f32 %v556_v3  ;;  %v568_v9 = vand.u32 2147483648, %v556_v3  ;;  %vm562_vm10 = vweird.f32 %v556_v3  ;;  %v566_v10 = vand.u32 2147483647, %v556_v3 }
 0x317   : > { %v569_v12 = vor.u32 1.1754944e-38, %v568_v9  ;;  %vm567_vm12 = vcmp.eq.f32.partialorder %v566_v10, 8.507059e+37 }
 0x31b   : > { %v795_v4 = vpop.eup %794 }
 0x31c   : > { %v558_v5 = vmul.f32 %v795_v4, %v556_v3  ;;  %vm563_vm9 = vweird.f32 %v795_v4 }
 0x31d   : > { %vm564_vm11 = vmor %vm562_vm10, %vm563_vm9 }
 0x31e   : > { %v559_v6 = vsub.f32 1.0, %v558_v5 }
 0x320   : > { %v560_v7 = vmul.f32 %v795_v4, %v559_v6 }
 0x322   : > { %v561_v8 = vadd.f32 %v795_v4, %v560_v7 }
 0x324   : > { %v565_v11 = vsel %vm564_vm11, %v795_v4, %v561_v8 }
 0x325   : > { %v570_v13 = vsel %vm567_vm12, %v569_v12, %v565_v11 }
 0x326   : > { %v577_v18 = vmul.f32 %v575_v17, %v570_v13 }
 0x383   : > { %v580_v14 = vpop.permute.xlu1 %579 }
 0x384   : > { %v582_v15 = vmul.f32 %v580_v14, %v570_v13 }
 0x386   : > { %584 = vrot.lane.b32.xlu0 %v582_v15, %s871_s29 }
 0x38e   : > { %487 = vrot.lane.b32.xlu0 %v480_v16, %s873_s12 }
 0x3f8   : > { %v585_v19 = vpop.permute.xlu0 %584 }
 0x3f9   : > { %v587_v20 = vadd.f32 %v585_v19, %v577_v18 }
 0x3fb   : > { %796 = vtanh.f32 %v587_v20  ;;  %v598_v21 = vsel %vm475_vm8, %v587_v20, %v575_v17 }
 0x3fc   : > { %605 = vrot.lane.b32.xlu2 %v598_v21, %s873_s12 }
 0x400   : > { %v488_v22 = vpop.permute.xlu0 %487 }
 0x401   : > { %v797_v23 = vpop.eup %796  ;;  %490 = vst.msk [vmem:[#allocation3] sm:$0xff] %vm377_vm2, %v488_v22 }
 0x402   : > { %590 = vrot.lane.b32.xlu1 %v797_v23, %s870_s19 }
 0x456   : > { %v606_v25 = vpop.permute.xlu2 %605 }
 0x457   : > { %608 = vst.msk [vmem:[#allocation3 + $0x8] sm:$0xff] %vm377_vm2, %v606_v25 }
 0x474   : > { %v591_v26 = vpop.permute.xlu1 %590 }
 0x475   : > { %v593_v27 = vmul.f32 %v591_v26, %v570_v13 }
 0x477   : > { %v597_v28 = vsel %vm475_vm8, %v593_v27, %v595_v24 }
 0x478   : > { %600 = vrot.lane.b32.xlu1 %v597_v28, %s871_s29 }
 0x4e8   : > { %613 = sbr.rel (%p743_p5) target bundleno = 1268 (0x4f4), region = 60 }
 0x4ea   : > { %v601_v29 = vpop.permute.xlu1 %600 }
 0x4eb   : > { %603 = vst.msk [vmem:[#allocation2 + $0x8] sm:$0xff] %vm377_vm2, %v601_v29 }
 0x4ec   : > { %609 = vst.msk [vmem:[%s951_s22] sm:$0xff] %vm377_vm2, %v601_v29 }
 0x4ed   : > { %v614_v30 = vld [vmem:[#allocation2] sm:$0xff]  ;;  %v618_v32 = vld [vmem:[#allocation3] sm:$0xff]  ;;  %v619_v33 = vld [vmem:[#allocation3 + $0x8] sm:$0xff] }
 0x4ee   : > { %616 = vst.msk [vmem:[#allocation4] sm:$0xff] %vm377_vm2, %v614_v30 }
 0x4ef   : > { %620 = vst.msk [vmem:[#allocation6] sm:$0xff] %vm377_vm2, %v618_v32 }
 0x4f0   : > { %621 = vst.msk [vmem:[#allocation6 + $0x8] sm:$0xff] %vm377_vm2, %v619_v33 }
 0x4f2   : > { %v615_v31 = vld [vmem:[#allocation2 + $0x8] sm:$0xff] }
 0x4f3   : > { %617 = vst.msk [vmem:[#allocation4 + $0x8] sm:$0xff] %vm377_vm2, %v615_v31 }
 0x4f4 PF: > { %p758_p6 = scmp.eq.s32.totalorder %s939_s14, 6  ;;  %s874_s22 = smov [#allocation4]  }
 0x4f5   : > { %s631_s19 = sshll.u32 %s874_s22, 4  ;;  %s633_s20 = sshll.u32 %s1095_s8, 4  ;;  %s632_s19 = int_to_ptr.vmem [resolvable:$true] %s631_s19  ;;  %s634_s20 = int_to_ptr.hbm [resolvable:$true] %s633_s20 }
 0x4f6   : > { %s875_s21 = smov 128   ;;  %s876_s23 = smov 8  }
 0x4f7   : > { %751 = dma.vmem_to_hbm [thread:$0]  (%p758_p6), %s632_s19, 256, %s634_s20, [#allocation5], %s875_s21, %s875_s21, %s876_s23  }
 0x4f8   : > { %s647_s26 = sshll.u32 %s1096_s9, 4  ;;  %s877_s27 = smov [#allocation6]   ;;  %s648_s26 = int_to_ptr.hbm [resolvable:$true] %s647_s26 }
 0x4f9   : > { %s645_s28 = sshll.u32 %s877_s27, 4  ;;  %s646_s28 = int_to_ptr.vmem [resolvable:$true] %s645_s28 }
 0x4fa   : > { %753 = dma.vmem_to_hbm [thread:$0]  (%p758_p6), %s646_s28, 256, %s648_s26, [#allocation7], %s875_s21, %s875_s21, %s876_s23  }
 0x4fb   : > { %859 = dma.done.wait (%p758_p6), [#allocation5], 256  }
 0x4fc   : > { %861 = vsyncadd (%p758_p6), [#allocation5], 4294967040 }
 0x4fd   : > { %863 = dma.done.wait (%p758_p6), [#allocation7], 256  }
 0x4fe   : > { %865 = vsyncadd (%p758_p6), [#allocation7], 4294967040 }
 0x4ff PF: > { %s23_s13 = sadd.s32 1, %s868_s13  }
 0x500   : > { %p20_p7 = scmp.ge.s32.totalorder %s23_s13, 9  }
 0x502   :  { %22 = sbr.rel (!%p20_p7) target bundleno = 2 (0x2), region = 109 }
 0x507   :  { %679 = vsyncpa [#allocation5], 1 }
 0x508   :  { %681 = vsyncpa [#allocation5 + $0x1], 1 }
 0x509   :  { %682 = vsyncpa [#allocation7], 1 }

</bundles_post_ra>
